<compile_context>
chip_gen: v5e
topology: v5e:2x2
jax: 0.10.0
libtpu: 0.0.40
codegen_flags: <defaults>
</compile_context>

<pallas_src>
import jax
import jax.numpy as jnp
from jax.experimental import pallas as pl
from jax.experimental.pallas import tpu as pltpu

_L2_COEF = 5e-4


def _pick_tiles(n, c, elem_budget=1 << 20):
    """Pick (tn, tc) so the f32 working set per block is ~elem_budget elements."""
    min_rows = 8
    if c <= elem_budget // min_rows:
        tc = c                                   # full rows affordable
    else:
        tc = max(128, ((elem_budget // min_rows) // 128) * 128)
    tn = max(min_rows, min(((elem_budget // tc) // 8) * 8, 1024))
    if n <= tn:
        tn = n                                   # whole batch in one block
    return tn, tc


def _make_kernel(n_total, c_total, c_steps, total_steps, num_weights):
    """Kernel closure: batch axis outer, class axis inner (both 'arbitrary')."""

    def kernel(logits_ref, target_ref, *rest):
        w_refs = rest[:num_weights]
        out_ref = rest[num_weights]
        m_ref, s_ref, p_ref, acc_ref, pen_ref = rest[num_weights + 1:]

        bi = pl.program_id(0)                    # batch tile
        ci = pl.program_id(1)                    # class chunk
        nb = pl.num_programs(0)
        nc = pl.num_programs(1)

        @pl.when(jnp.logical_and(bi == 0, ci == 0))
        def _init_carry():
            acc_ref[...] = jnp.zeros_like(acc_ref)
            pen_ref[...] = jnp.zeros_like(pen_ref)

        @pl.when(ci == 0)
        def _init_row_state():
            m_ref[...] = jnp.full_like(m_ref, -jnp.inf)
            s_ref[...] = jnp.zeros_like(s_ref)
            p_ref[...] = jnp.zeros_like(p_ref)

        # ---- online log-sum-exp over this (tn, tc) class chunk --------------
        chunk = logits_ref[...].astype(jnp.float32)          # f32 only after load
        tn, tc = chunk.shape
        tgt = target_ref[...]                                 # (tn, 1) int32

        cols = jax.lax.broadcasted_iota(jnp.int32, (tn, tc), 1) + ci * tc
        chunk_v = jnp.where(cols < c_total, chunk, jnp.float32(-jnp.inf))

        m_prev = m_ref[...]
        m_new = jnp.maximum(m_prev, jnp.max(chunk_v, axis=-1, keepdims=True))
        shifted = chunk_v - m_new                             # reused tensor
        s_ref[...] = (s_ref[...] * jnp.exp(m_prev - m_new)
                      + jnp.sum(jnp.exp(shifted), axis=-1, keepdims=True))
        # target column lives in exactly one chunk; accumulate raw logit
        p_ref[...] += jnp.sum(jnp.where(cols == tgt, chunk, 0.0),
                              axis=-1, keepdims=True)
        m_ref[...] = m_new

        # ---- end of a batch tile's class sweep: fold CE into running sum ----
        @pl.when(ci == nc - 1)
        def _accum_ce():
            ce = jnp.log(s_ref[...]) + m_ref[...] - p_ref[...]     # (tn, 1)
            rows = jax.lax.broadcasted_iota(jnp.int32, (tn, 1), 0) + bi * tn
            acc_ref[...] += jnp.where(rows < n_total, ce, 0.0)

        # ---- L2 sum-of-squares, one weight per grid step (hides under DMA) --
        flat = bi * c_steps + ci
        for k, w_ref in enumerate(w_refs):
            @pl.when(flat == (k % total_steps))
            def _add_pen(w_ref=w_ref):
                wf = w_ref[...].astype(jnp.float32)
                pen_ref[...] += jnp.sum(wf * wf, keepdims=True)    # (1, 1)

        # ---- final step: write scalar loss -----------------------------------
        @pl.when(jnp.logical_and(bi == nb - 1, ci == nc - 1))
        def _finalize():
            ce_mean = jnp.sum(acc_ref[...], keepdims=True) * jnp.float32(1.0 / n_total)
            out_ref[...] = ce_mean + jnp.float32(_L2_COEF) * pen_ref[...]

    return kernel


def penalty_cross_entropy(predict, target, penalty_term=(), *,
                          elem_budget=1 << 20,
                          resident_weight_bytes=2 << 20):
    """predict: (N, C) logits (any float dtype, kept native on the wire);
    target: (N,) int class ids; penalty_term: iterable of weight arrays."""
    predict = jnp.asarray(predict)
    n, c = predict.shape
    tgt2d = jnp.asarray(target).reshape(n, 1).astype(jnp.int32)

    # Small penalty tensors stay VMEM-resident in the kernel (their sumsq hides
    # under DMA slack); large ones are reduced with plain XLA in the wrapper so
    # they never squeeze the logits pipeline.
    w2ds, big = [], []
    budget = resident_weight_bytes
    for w in penalty_term:
        w = jnp.asarray(w)
        if w.ndim == 0:
            w2 = w.reshape(1, 1)
        elif w.ndim == 1:
            w2 = w.reshape(1, -1)
        else:
            w2 = w.reshape(-1, w.shape[-1])
        nbytes = w2.size * jnp.dtype(w2.dtype).itemsize
        if nbytes <= budget:
            budget -= nbytes
            w2ds.append(w2)
        else:
            big.append(w)

    tn, tc = _pick_tiles(n, c, elem_budget)
    b_steps = pl.cdiv(n, tn)
    c_steps = pl.cdiv(c, tc)
    total_steps = b_steps * c_steps
    grid = (b_steps, c_steps)

    in_specs = [
        pl.BlockSpec((tn, tc), lambda bi, ci: (bi, ci)),      # logits tile
        pl.BlockSpec((tn, 1), lambda bi, ci: (bi, 0)),        # target tile
    ] + [
        pl.BlockSpec(w.shape, lambda bi, ci: (0, 0))          # resident weights
        for w in w2ds
    ]

    # VMEM budget: double-buffered logits + f32 temps + resident weights + scratch.
    in_bytes = jnp.dtype(predict.dtype).itemsize
    block_bytes = tn * tc * in_bytes
    f32_tmp = tn * tc * 4
    w_bytes = sum(w.size * jnp.dtype(w.dtype).itemsize for w in w2ds)
    est = (2 * block_bytes + 3 * f32_tmp + 2 * tn * 4
           + 2 * w_bytes + 8 * tn * 4 + (2 << 20))
    vmem_limit = int(min(max(est, 8 << 20), 48 << 20))

    kernel = _make_kernel(n, c, c_steps, total_steps, len(w2ds))

    out = pl.pallas_call(
        kernel,
        out_shape=jax.ShapeDtypeStruct((1, 1), jnp.float32),
        grid=grid,
        in_specs=in_specs,
        out_specs=pl.BlockSpec((1, 1), lambda bi, ci: (0, 0)),
        scratch_shapes=[pltpu.VMEM((tn, 1), jnp.float32),     # running max
                        pltpu.VMEM((tn, 1), jnp.float32),     # running sum-exp
                        pltpu.VMEM((tn, 1), jnp.float32),     # picked logit
                        pltpu.VMEM((tn, 1), jnp.float32),     # per-row CE accumulator
                        pltpu.VMEM((1, 1), jnp.float32)],     # L2 penalty accumulator
        compiler_params=pltpu.CompilerParams(
            dimension_semantics=("arbitrary", "arbitrary"),
            vmem_limit_bytes=vmem_limit),
    )(predict, tgt2d, *w2ds)

    loss = out[0, 0]
    for w in big:  # large weights: reduce outside the kernel (keeps VMEM flat)
        wf = jnp.asarray(w, jnp.float32)
        loss = loss + jnp.float32(_L2_COEF) * jnp.sum(wf * wf)
    return loss


def _reference_loss(predict, target, penalty_term):
    logp = jax.nn.log_softmax(predict.astype(jnp.float32), axis=-1)
    ce = -jnp.mean(logp[jnp.arange(predict.shape[0]), target])
    for w in penalty_term:
        ce = ce + 0.0005 * jnp.sum(jnp.asarray(w, jnp.float32) ** 2)
    return ce


if __name__ == "__main__":
    key = jax.random.PRNGKey(0)
    k_logits, k_tgt, k_w1, k_b1, k_w2 = jax.random.split(key, 5)

    N, C = 8, 128                      # batch=8, num_classes=128
    predict = jax.random.normal(k_logits, (N, C), dtype=jnp.float32)
    target = jax.random.randint(k_tgt, (N,), 0, C, dtype=jnp.int32)

    # deterministic "model weights" acting as the penalty terms
    penalty_term = [
        jax.random.normal(k_w1, (32, 64), dtype=jnp.float32) * 0.1,
        jax.random.normal(k_b1, (64,), dtype=jnp.float32) * 0.1,
        jax.random.normal(k_w2, (64, 16), dtype=jnp.float32) * 0.1,
    ]

    loss = penalty_cross_entropy(predict, target, penalty_term)
    loss = jax.block_until_ready(loss)

    ref = _reference_loss(predict, target, penalty_term)
    assert jnp.allclose(loss, ref, rtol=1e-5, atol=1e-5), (loss, ref)

    print("KERNEL_OK")
</pallas_src>

<mosaic_0001>
module attributes {stable_mosaic.version = 11 : i64} {
  func.func @kernel(%arg0: i32, %arg1: i32, %arg2: memref<8x128xf32, #tpu.memory_space<vmem>>, %arg3: memref<8x1xi32, #tpu.memory_space<vmem>>, %arg4: memref<32x64xf32, #tpu.memory_space<vmem>>, %arg5: memref<1x64xf32, #tpu.memory_space<vmem>>, %arg6: memref<64x16xf32, #tpu.memory_space<vmem>>, %arg7: memref<1x1xf32, #tpu.memory_space<vmem>>, %arg8: memref<8x1xf32, #tpu.memory_space<vmem>>, %arg9: memref<8x1xf32, #tpu.memory_space<vmem>>, %arg10: memref<8x1xf32, #tpu.memory_space<vmem>>, %arg11: memref<8x1xf32, #tpu.memory_space<vmem>>, %arg12: memref<1x1xf32, #tpu.memory_space<vmem>>) attributes {dimension_semantics = [#tpu.dimension_semantics<arbitrary>, #tpu.dimension_semantics<arbitrary>], iteration_bounds = array<i64: 1, 1>, scalar_prefetch = 0 : i64, scratch_operands = 5 : i64, tpu.core_type = #tpu.core_type<tc>, window_params = [{transform_indices = @transform_0, window_bounds = array<i64: 8, 128>}, {transform_indices = @transform_1, window_bounds = array<i64: 8, 1>}, {pipeline_mode = #tpu.pipeline_mode<synchronous>, transform_indices = @transform_2, window_bounds = array<i64: 32, 64>}, {pipeline_mode = #tpu.pipeline_mode<synchronous>, transform_indices = @transform_3, window_bounds = array<i64: 1, 64>}, {pipeline_mode = #tpu.pipeline_mode<synchronous>, transform_indices = @transform_4, window_bounds = array<i64: 64, 16>}, {pipeline_mode = #tpu.pipeline_mode<synchronous>, transform_indices = @transform_5, window_bounds = array<i64: 1, 1>}]} {
    %c0_i32 = arith.constant 0 : i32
    %0 = arith.cmpi eq, %arg0, %c0_i32 : i32
    %c0_i32_0 = arith.constant 0 : i32
    %1 = arith.cmpi eq, %arg1, %c0_i32_0 : i32
    %2 = arith.andi %0, %1 : i1
    %3 = arith.extui %2 : i1 to i32
    %c0_i32_1 = arith.constant 0 : i32
    %4 = arith.cmpi ne, %3, %c0_i32_1 : i32
    scf.if %4 {
      %cst_35 = arith.constant 0.000000e+00 : f32
      %62 = vector.broadcast %cst_35 : f32 to vector<8x1xf32>
      %c0_36 = arith.constant 0 : index
      %c0_37 = arith.constant 0 : index
      %63 = vector.load %arg11[%c0_36, %c0_37] : memref<8x1xf32, #tpu.memory_space<vmem>>, vector<8x1xf32>
      tpu.vector_store %arg11[%c0_36, %c0_37], %62 {strides = array<i32>} : memref<8x1xf32, #tpu.memory_space<vmem>>, vector<8x1xf32>,
      %cst_38 = arith.constant 0.000000e+00 : f32
      %64 = vector.broadcast %cst_38 : f32 to vector<1x1xf32>
      %c0_39 = arith.constant 0 : index
      %c0_40 = arith.constant 0 : index
      %65 = vector.load %arg12[%c0_39, %c0_40] : memref<1x1xf32, #tpu.memory_space<vmem>>, vector<1x1xf32>
      tpu.vector_store %arg12[%c0_39, %c0_40], %64 {strides = array<i32>} : memref<1x1xf32, #tpu.memory_space<vmem>>, vector<1x1xf32>,
    } else {
    }
    %c0_i32_2 = arith.constant 0 : i32
    %5 = arith.cmpi eq, %arg1, %c0_i32_2 : i32
    %6 = arith.extui %5 : i1 to i32
    %c0_i32_3 = arith.constant 0 : i32
    %7 = arith.cmpi ne, %6, %c0_i32_3 : i32
    scf.if %7 {
      %cst_35 = arith.constant 0xFF800000 : f32
      %62 = vector.broadcast %cst_35 : f32 to vector<8x1xf32>
      %c0_36 = arith.constant 0 : index
      %c0_37 = arith.constant 0 : index
      %63 = vector.load %arg8[%c0_36, %c0_37] : memref<8x1xf32, #tpu.memory_space<vmem>>, vector<8x1xf32>
      tpu.vector_store %arg8[%c0_36, %c0_37], %62 {strides = array<i32>} : memref<8x1xf32, #tpu.memory_space<vmem>>, vector<8x1xf32>,
      %cst_38 = arith.constant 0.000000e+00 : f32
      %64 = vector.broadcast %cst_38 : f32 to vector<8x1xf32>
      %c0_39 = arith.constant 0 : index
      %c0_40 = arith.constant 0 : index
      %65 = vector.load %arg9[%c0_39, %c0_40] : memref<8x1xf32, #tpu.memory_space<vmem>>, vector<8x1xf32>
      tpu.vector_store %arg9[%c0_39, %c0_40], %64 {strides = array<i32>} : memref<8x1xf32, #tpu.memory_space<vmem>>, vector<8x1xf32>,
      %cst_41 = arith.constant 0.000000e+00 : f32
      %66 = vector.broadcast %cst_41 : f32 to vector<8x1xf32>
      %c0_42 = arith.constant 0 : index
      %c0_43 = arith.constant 0 : index
      %67 = vector.load %arg10[%c0_42, %c0_43] : memref<8x1xf32, #tpu.memory_space<vmem>>, vector<8x1xf32>
      tpu.vector_store %arg10[%c0_42, %c0_43], %66 {strides = array<i32>} : memref<8x1xf32, #tpu.memory_space<vmem>>, vector<8x1xf32>,
    } else {
    }
    %c0 = arith.constant 0 : index
    %c0_4 = arith.constant 0 : index
    %8 = vector.load %arg2[%c0, %c0_4] : memref<8x128xf32, #tpu.memory_space<vmem>>, vector<8x128xf32>
    %c0_5 = arith.constant 0 : index
    %c0_6 = arith.constant 0 : index
    %9 = vector.load %arg3[%c0_5, %c0_6] : memref<8x1xi32, #tpu.memory_space<vmem>>, vector<8x1xi32>
    %10 = tpu.iota {dimensions = array<i32: 1>} : vector<8x128xi32>
    %c128_i32 = arith.constant 128 : i32
    %11 = arith.muli %arg1, %c128_i32 : i32
    %12 = vector.broadcast %11 : i32 to vector<8x128xi32>
    %13 = arith.addi %10, %12 : vector<8x128xi32>
    %c128_i32_7 = arith.constant 128 : i32
    %14 = vector.broadcast %c128_i32_7 : i32 to vector<8x128xi32>
    %15 = arith.cmpi slt, %13, %14 : vector<8x128xi32>
    %cst = arith.constant 0xFF800000 : f32
    %16 = vector.broadcast %cst : f32 to vector<8x128xf32>
    %17 = arith.select %15, %8, %16 : vector<8x128xi1>, vector<8x128xf32>
    %c0_8 = arith.constant 0 : index
    %c0_9 = arith.constant 0 : index
    %18 = vector.load %arg8[%c0_8, %c0_9] : memref<8x1xf32, #tpu.memory_space<vmem>>, vector<8x1xf32>
    %cst_10 = arith.constant dense<0xFF800000> : vector<8xf32>
    %19 = vector.multi_reduction <maximumf>, %17, %cst_10 [1] : vector<8x128xf32> to vector<8xf32>
    %20 = vector.shape_cast %19 : vector<8xf32> to vector<8x1xf32>
    %21 = arith.maximumf %18, %20 : vector<8x1xf32>
    %22 = vector.broadcast %21 : vector<8x1xf32> to vector<8x128xf32>
    %23 = arith.subf %17, %22 : vector<8x128xf32>
    %c0_11 = arith.constant 0 : index
    %c0_12 = arith.constant 0 : index
    %24 = vector.load %arg9[%c0_11, %c0_12] : memref<8x1xf32, #tpu.memory_space<vmem>>, vector<8x1xf32>
    %25 = arith.subf %18, %21 : vector<8x1xf32>
    %26 = math.exp %25 : vector<8x1xf32>
    %27 = arith.mulf %24, %26 : vector<8x1xf32>
    %28 = math.exp %23 : vector<8x128xf32>
    %cst_13 = arith.constant dense<0.000000e+00> : vector<8xf32>
    %29 = vector.multi_reduction <add>, %28, %cst_13 [1] : vector<8x128xf32> to vector<8xf32>
    %30 = vector.shape_cast %29 : vector<8xf32> to vector<8x1xf32>
    %31 = arith.addf %27, %30 : vector<8x1xf32>
    %c0_14 = arith.constant 0 : index
    %c0_15 = arith.constant 0 : index
    %32 = vector.load %arg9[%c0_14, %c0_15] : memref<8x1xf32, #tpu.memory_space<vmem>>, vector<8x1xf32>
    tpu.vector_store %arg9[%c0_14, %c0_15], %31 {strides = array<i32>} : memref<8x1xf32, #tpu.memory_space<vmem>>, vector<8x1xf32>,
    %c0_16 = arith.constant 0 : index
    %c0_17 = arith.constant 0 : index
    %33 = vector.load %arg10[%c0_16, %c0_17] : memref<8x1xf32, #tpu.memory_space<vmem>>, vector<8x1xf32>
    %34 = vector.broadcast %9 : vector<8x1xi32> to vector<8x128xi32>
    %35 = arith.cmpi eq, %13, %34 : vector<8x128xi32>
    %cst_18 = arith.constant 0.000000e+00 : f32
    %36 = vector.broadcast %cst_18 : f32 to vector<8x128xf32>
    %37 = arith.select %35, %8, %36 : vector<8x128xi1>, vector<8x128xf32>
    %cst_19 = arith.constant dense<0.000000e+00> : vector<8xf32>
    %38 = vector.multi_reduction <add>, %37, %cst_19 [1] : vector<8x128xf32> to vector<8xf32>
    %39 = vector.shape_cast %38 : vector<8xf32> to vector<8x1xf32>
    %40 = arith.addf %33, %39 : vector<8x1xf32>
    %c0_20 = arith.constant 0 : index
    %c0_21 = arith.constant 0 : index
    %41 = vector.load %arg10[%c0_20, %c0_21] : memref<8x1xf32, #tpu.memory_space<vmem>>, vector<8x1xf32>
    tpu.vector_store %arg10[%c0_20, %c0_21], %40 {strides = array<i32>} : memref<8x1xf32, #tpu.memory_space<vmem>>, vector<8x1xf32>,
    %c0_22 = arith.constant 0 : index
    %c0_23 = arith.constant 0 : index
    %42 = vector.load %arg8[%c0_22, %c0_23] : memref<8x1xf32, #tpu.memory_space<vmem>>, vector<8x1xf32>
    tpu.vector_store %arg8[%c0_22, %c0_23], %21 {strides = array<i32>} : memref<8x1xf32, #tpu.memory_space<vmem>>, vector<8x1xf32>,
    %c0_i32_24 = arith.constant 0 : i32
    %43 = arith.cmpi eq, %arg1, %c0_i32_24 : i32
    %44 = arith.extui %43 : i1 to i32
    %c0_i32_25 = arith.constant 0 : i32
    %45 = arith.cmpi ne, %44, %c0_i32_25 : i32
    scf.if %45 {
      %c0_35 = arith.constant 0 : index
      %c0_36 = arith.constant 0 : index
      %62 = vector.load %arg9[%c0_35, %c0_36] : memref<8x1xf32, #tpu.memory_space<vmem>>, vector<8x1xf32>
      %63 = math.log %62 : vector<8x1xf32>
      %c0_37 = arith.constant 0 : index
      %c0_38 = arith.constant 0 : index
      %64 = vector.load %arg8[%c0_37, %c0_38] : memref<8x1xf32, #tpu.memory_space<vmem>>, vector<8x1xf32>
      %65 = arith.addf %63, %64 : vector<8x1xf32>
      %c0_39 = arith.constant 0 : index
      %c0_40 = arith.constant 0 : index
      %66 = vector.load %arg10[%c0_39, %c0_40] : memref<8x1xf32, #tpu.memory_space<vmem>>, vector<8x1xf32>
      %67 = arith.subf %65, %66 : vector<8x1xf32>
      %68 = tpu.iota {dimensions = array<i32: 0>} : vector<8x1xi32>
      %c8_i32 = arith.constant 8 : i32
      %69 = arith.muli %arg0, %c8_i32 : i32
      %70 = vector.broadcast %69 : i32 to vector<8x1xi32>
      %71 = arith.addi %68, %70 : vector<8x1xi32>
      %c0_41 = arith.constant 0 : index
      %c0_42 = arith.constant 0 : index
      %72 = vector.load %arg11[%c0_41, %c0_42] : memref<8x1xf32, #tpu.memory_space<vmem>>, vector<8x1xf32>
      %c8_i32_43 = arith.constant 8 : i32
      %73 = vector.broadcast %c8_i32_43 : i32 to vector<8x1xi32>
      %74 = arith.cmpi slt, %71, %73 : vector<8x1xi32>
      %cst_44 = arith.constant 0.000000e+00 : f32
      %75 = vector.broadcast %cst_44 : f32 to vector<8x1xf32>
      %76 = arith.select %74, %67, %75 : vector<8x1xi1>, vector<8x1xf32>
      %77 = arith.addf %72, %76 : vector<8x1xf32>
      %c0_45 = arith.constant 0 : index
      %c0_46 = arith.constant 0 : index
      %78 = vector.load %arg11[%c0_45, %c0_46] : memref<8x1xf32, #tpu.memory_space<vmem>>, vector<8x1xf32>
      tpu.vector_store %arg11[%c0_45, %c0_46], %77 {strides = array<i32>} : memref<8x1xf32, #tpu.memory_space<vmem>>, vector<8x1xf32>,
    } else {
    }
    %c1_i32 = arith.constant 1 : i32
    %46 = arith.muli %arg0, %c1_i32 : i32
    %47 = arith.addi %46, %arg1 : i32
    %c0_i32_26 = arith.constant 0 : i32
    %48 = arith.cmpi eq, %47, %c0_i32_26 : i32
    %49 = arith.extui %48 : i1 to i32
    %c0_i32_27 = arith.constant 0 : i32
    %50 = arith.cmpi ne, %49, %c0_i32_27 : i32
    scf.if %50 {
      %c0_35 = arith.constant 0 : index
      %c0_36 = arith.constant 0 : index
      %62 = vector.load %arg4[%c0_35, %c0_36] : memref<32x64xf32, #tpu.memory_space<vmem>>, vector<32x64xf32>
      %c0_37 = arith.constant 0 : index
      %c0_38 = arith.constant 0 : index
      %63 = vector.load %arg12[%c0_37, %c0_38] : memref<1x1xf32, #tpu.memory_space<vmem>>, vector<1x1xf32>
      %64 = arith.mulf %62, %62 : vector<32x64xf32>
      %65 = vector.shape_cast %64 : vector<32x64xf32> to vector<1x32x64xf32>
      %cst_39 = arith.constant dense<0.000000e+00> : vector<1xf32>
      %66 = vector.multi_reduction <add>, %65, %cst_39 [1, 2] : vector<1x32x64xf32> to vector<1xf32>
      %67 = vector.shape_cast %66 : vector<1xf32> to vector<1x1x1xf32>
      %68 = vector.extract %67[0, 0, 0] : f32 from vector<1x1x1xf32>
      %69 = vector.broadcast %68 : f32 to vector<1x1xf32>
      %70 = arith.addf %63, %69 : vector<1x1xf32>
      %c0_40 = arith.constant 0 : index
      %c0_41 = arith.constant 0 : index
      %71 = vector.load %arg12[%c0_40, %c0_41] : memref<1x1xf32, #tpu.memory_space<vmem>>, vector<1x1xf32>
      tpu.vector_store %arg12[%c0_40, %c0_41], %70 {strides = array<i32>} : memref<1x1xf32, #tpu.memory_space<vmem>>, vector<1x1xf32>,
    } else {
    }
    %c0_i32_28 = arith.constant 0 : i32
    %51 = arith.cmpi eq, %47, %c0_i32_28 : i32
    %52 = arith.extui %51 : i1 to i32
    %c0_i32_29 = arith.constant 0 : i32
    %53 = arith.cmpi ne, %52, %c0_i32_29 : i32
    scf.if %53 {
      %c0_35 = arith.constant 0 : index
      %c0_36 = arith.constant 0 : index
      %62 = vector.load %arg5[%c0_35, %c0_36] : memref<1x64xf32, #tpu.memory_space<vmem>>, vector<1x64xf32>
      %c0_37 = arith.constant 0 : index
      %c0_38 = arith.constant 0 : index
      %63 = vector.load %arg12[%c0_37, %c0_38] : memref<1x1xf32, #tpu.memory_space<vmem>>, vector<1x1xf32>
      %64 = arith.mulf %62, %62 : vector<1x64xf32>
      %65 = vector.shape_cast %64 : vector<1x64xf32> to vector<1x1x64xf32>
      %cst_39 = arith.constant dense<0.000000e+00> : vector<1xf32>
      %66 = vector.multi_reduction <add>, %65, %cst_39 [1, 2] : vector<1x1x64xf32> to vector<1xf32>
      %67 = vector.shape_cast %66 : vector<1xf32> to vector<1x1x1xf32>
      %68 = vector.extract %67[0, 0, 0] : f32 from vector<1x1x1xf32>
      %69 = vector.broadcast %68 : f32 to vector<1x1xf32>
      %70 = arith.addf %63, %69 : vector<1x1xf32>
      %c0_40 = arith.constant 0 : index
      %c0_41 = arith.constant 0 : index
      %71 = vector.load %arg12[%c0_40, %c0_41] : memref<1x1xf32, #tpu.memory_space<vmem>>, vector<1x1xf32>
      tpu.vector_store %arg12[%c0_40, %c0_41], %70 {strides = array<i32>} : memref<1x1xf32, #tpu.memory_space<vmem>>, vector<1x1xf32>,
    } else {
    }
    %c0_i32_30 = arith.constant 0 : i32
    %54 = arith.cmpi eq, %47, %c0_i32_30 : i32
    %55 = arith.extui %54 : i1 to i32
    %c0_i32_31 = arith.constant 0 : i32
    %56 = arith.cmpi ne, %55, %c0_i32_31 : i32
    scf.if %56 {
      %c0_35 = arith.constant 0 : index
      %c0_36 = arith.constant 0 : index
      %62 = vector.load %arg6[%c0_35, %c0_36] : memref<64x16xf32, #tpu.memory_space<vmem>>, vector<64x16xf32>
      %c0_37 = arith.constant 0 : index
      %c0_38 = arith.constant 0 : index
      %63 = vector.load %arg12[%c0_37, %c0_38] : memref<1x1xf32, #tpu.memory_space<vmem>>, vector<1x1xf32>
      %64 = arith.mulf %62, %62 : vector<64x16xf32>
      %65 = vector.shape_cast %64 : vector<64x16xf32> to vector<1x64x16xf32>
      %cst_39 = arith.constant dense<0.000000e+00> : vector<1xf32>
      %66 = vector.multi_reduction <add>, %65, %cst_39 [1, 2] : vector<1x64x16xf32> to vector<1xf32>
      %67 = vector.shape_cast %66 : vector<1xf32> to vector<1x1x1xf32>
      %68 = vector.extract %67[0, 0, 0] : f32 from vector<1x1x1xf32>
      %69 = vector.broadcast %68 : f32 to vector<1x1xf32>
      %70 = arith.addf %63, %69 : vector<1x1xf32>
      %c0_40 = arith.constant 0 : index
      %c0_41 = arith.constant 0 : index
      %71 = vector.load %arg12[%c0_40, %c0_41] : memref<1x1xf32, #tpu.memory_space<vmem>>, vector<1x1xf32>
      tpu.vector_store %arg12[%c0_40, %c0_41], %70 {strides = array<i32>} : memref<1x1xf32, #tpu.memory_space<vmem>>, vector<1x1xf32>,
    } else {
    }
    %c0_i32_32 = arith.constant 0 : i32
    %57 = arith.cmpi eq, %arg0, %c0_i32_32 : i32
    %c0_i32_33 = arith.constant 0 : i32
    %58 = arith.cmpi eq, %arg1, %c0_i32_33 : i32
    %59 = arith.andi %57, %58 : i1
    %60 = arith.extui %59 : i1 to i32
    %c0_i32_34 = arith.constant 0 : i32
    %61 = arith.cmpi ne, %60, %c0_i32_34 : i32
    scf.if %61 {
      %c0_35 = arith.constant 0 : index
      %c0_36 = arith.constant 0 : index
      %62 = vector.load %arg11[%c0_35, %c0_36] : memref<8x1xf32, #tpu.memory_space<vmem>>, vector<8x1xf32>
      %63 = vector.shape_cast %62 : vector<8x1xf32> to vector<1x8x1xf32>
      %cst_37 = arith.constant dense<0.000000e+00> : vector<1xf32>
      %64 = vector.multi_reduction <add>, %63, %cst_37 [1, 2] : vector<1x8x1xf32> to vector<1xf32>
      %65 = vector.shape_cast %64 : vector<1xf32> to vector<1x1x1xf32>
      %66 = vector.extract %65[0, 0, 0] : f32 from vector<1x1x1xf32>
      %67 = vector.broadcast %66 : f32 to vector<1x1xf32>
      %cst_38 = arith.constant 1.250000e-01 : f32
      %68 = vector.broadcast %cst_38 : f32 to vector<1x1xf32>
      %69 = arith.mulf %67, %68 : vector<1x1xf32>
      %c0_39 = arith.constant 0 : index
      %c0_40 = arith.constant 0 : index
      %70 = vector.load %arg12[%c0_39, %c0_40] : memref<1x1xf32, #tpu.memory_space<vmem>>, vector<1x1xf32>
      %cst_41 = arith.constant 5.000000e-04 : f32
      %71 = vector.broadcast %cst_41 : f32 to vector<1x1xf32>
      %72 = arith.mulf %71, %70 : vector<1x1xf32>
      %73 = arith.addf %69, %72 : vector<1x1xf32>
      %c0_42 = arith.constant 0 : index
      %c0_43 = arith.constant 0 : index
      %74 = vector.load %arg7[%c0_42, %c0_43] : memref<1x1xf32, #tpu.memory_space<vmem>>, vector<1x1xf32>
      tpu.vector_store %arg7[%c0_42, %c0_43], %73 {strides = array<i32>} : memref<1x1xf32, #tpu.memory_space<vmem>>, vector<1x1xf32>,
    } else {
    }
    return
  }
  func.func @transform_0(%arg0: i32, %arg1: i32) -> (i32, i32) {
    %c0_i32 = arith.constant 0 : i32
    return %arg0, %arg1 : i32, i32
  }
  func.func @transform_1(%arg0: i32, %arg1: i32) -> (i32, i32) {
    %c0_i32 = arith.constant 0 : i32
    %c0_i32_0 = arith.constant 0 : i32
    return %arg0, %c0_i32 : i32, i32
  }
  func.func @transform_2(%arg0: i32, %arg1: i32) -> (i32, i32) {
    %c0_i32 = arith.constant 0 : i32
    %c0_i32_0 = arith.constant 0 : i32
    %c0_i32_1 = arith.constant 0 : i32
    return %c0_i32, %c0_i32_0 : i32, i32
  }
  func.func @transform_3(%arg0: i32, %arg1: i32) -> (i32, i32) {
    %c0_i32 = arith.constant 0 : i32
    %c0_i32_0 = arith.constant 0 : i32
    %c0_i32_1 = arith.constant 0 : i32
    return %c0_i32, %c0_i32_0 : i32, i32
  }
  func.func @transform_4(%arg0: i32, %arg1: i32) -> (i32, i32) {
    %c0_i32 = arith.constant 0 : i32
    %c0_i32_0 = arith.constant 0 : i32
    %c0_i32_1 = arith.constant 0 : i32
    return %c0_i32, %c0_i32_0 : i32, i32
  }
  func.func @transform_5(%arg0: i32, %arg1: i32) -> (i32, i32) {
    %c0_i32 = arith.constant 0 : i32
    %c0_i32_0 = arith.constant 0 : i32
    %c0_i32_1 = arith.constant 0 : i32
    return %c0_i32, %c0_i32_0 : i32, i32
  }
}

</mosaic_0001>

<bundles_post_ra>
// kernel: tpu_custom_call.1
= control target key start
LH: loop header
LB: loop body
LE: loop exit
PB: predicated region body
PF: predicated region fallthrough
CT: control target
= control target key end

     0   :  { %s403_s0 = inlined_call_operand.vmem [shape: f32[8,128], index: 0, kind: input, shape index: {}]   ;;  %s404_s1 = inlined_call_operand.vmem [shape: s32[8,1], index: 1, kind: input, shape index: {}]   ;;  %s405_s2 = inlined_call_operand.vmem [shape: f32[32,64], index: 2, kind: input, shape index: {}]   ;;  %s406_s3 = inlined_call_operand.vmem [shape: f32[1,64], index: 3, kind: input, shape index: {}]   ;;  %s407_s4 = inlined_call_operand.vmem [shape: f32[64,16], index: 4, kind: input, shape index: {}]   ;;  %s408_s5 = inlined_call_operand.hbm [shape: f32[1,1], index: 5, kind: output, shape index: {}]  }
   0x1   :  { %v38_v0 = vld [vmem:[%s403_s0] sm:$0xff] }
   0x2   :  { %10 = vsyncpa [#allocation8], 0  ;;  %48 = vmax.xlane.f32.xlu0 %v38_v0  ;;  %vm27_vm0 = vcmask 7168   ;;  %v279_v1 = vmov -inf   ;;  %v280_v2 = vmov 0   ;;  %v281_v3 = vmov 0.0  }
   0x3   :  { %35 = vst.msk [vmem:[#allocation2] sm:$0xff] %vm27_vm0, %v279_v1  ;;  %245 = vset.pattern.permute.xlu0 %v280_v2  ;;  %246 = vset.pattern.permute.xlu1 %v280_v2  ;;  %v39_v4 = vld [vmem:[%s404_s1] sm:$0xff]  ;;  %v40_v9 = vlaneseq  ;;  %v106_v11 = vld [vmem:[%s405_s2 + $0x8] sm:$0xff]  ;;  %v107_v12 = vld [vmem:[%s405_s2 + $0x10] sm:$0xff]  ;;  %vm114_vm1 = vcmask 523264   ;;  %vm169_vm3 = vcmask 130048  }
   0x4   :  { %36 = vst.msk [vmem:[#allocation3] sm:$0xff] %vm27_vm0, %v281_v3  ;;  %71 = vperm.xlu1 %246, %v39_v4   ;;  %v105_v10 = vld [vmem:[%s405_s2] sm:$0xff]  ;;  %v108_v14 = vld [vmem:[%s405_s2 + $0x18] sm:$0xff]  ;;  %v111_v16 = vmul.f32 %v106_v11, %v106_v11  ;;  %v112_v17 = vmul.f32 %v107_v12, %v107_v12  ;;  %v153_v33 = vld [vmem:[%s407_s4 + $0x8] sm:$0xff]  ;;  %vm138_vm4 = vcmask 516096   ;;  %vm29_vm5 = vcmask 0  }
   0x5   :  { %28 = vst.msk [vmem:[#allocation5] sm:$0xff] %vm27_vm0, %v281_v3  ;;  %v110_v15 = vmul.f32 %v105_v10, %v105_v10  ;;  %v41_v18 = vand.u32 127, %v40_v9  ;;  %v113_v19 = vmul.f32 %v108_v14, %v108_v14  ;;  %v152_v32 = vld [vmem:[%s407_s4] sm:$0xff]  ;;  %v162_v35 = vmul.f32 %v153_v33, %v153_v33  ;;  %v154_v36 = vld [vmem:[%s407_s4 + $0x10] sm:$0xff]  ;;  %v155_v41 = vld [vmem:[%s407_s4 + $0x18] sm:$0xff]  ;;  %s282_s21 = smov [#allocation7]  }
   0x6   :  { %37 = vst.msk [vmem:[#allocation4] sm:$0xff] %vm27_vm0, %v281_v3  ;;  %v116_v21 = vsel %vm114_vm1, %v111_v16, 0.0  ;;  %v118_v22 = vsel %vm114_vm1, %v112_v17, 0.0  ;;  %v161_v34 = vmul.f32 %v152_v32, %v152_v32  ;;  %v163_v37 = vmul.f32 %v154_v36, %v154_v36  ;;  %v135_v40 = vld [vmem:[%s406_s3] sm:$0x1]  ;;  %v157_v51 = vld [vmem:[%s407_s4 + $0x28] sm:$0xff] }
   0x7   :  { %v115_v20 = vsel %vm114_vm1, %v110_v15, 0.0  ;;  %v120_v26 = vsel %vm114_vm1, %v113_v19, 0.0  ;;  %v171_v39 = vsel %vm169_vm3, %v162_v35, 0.0  ;;  %v137_v43 = vmul.f32 %v135_v40, %v135_v40  ;;  %v156_v46 = vld [vmem:[%s407_s4 + $0x20] sm:$0xff]  ;;  %v158_v57 = vld [vmem:[%s407_s4 + $0x30] sm:$0xff]  ;;  %v159_v62 = vld [vmem:[%s407_s4 + $0x38] sm:$0xff] }
   0x8   :  { %v117_v23 = vadd.f32 %v116_v21, %v115_v20  ;;  %v170_v38 = vsel %vm169_vm3, %v161_v34, 0.0  ;;  %v164_v44 = vmul.f32 %v155_v41, %v155_v41  ;;  %v173_v45 = vsel %vm169_vm3, %v163_v37, 0.0  ;;  %30 = vst.msk [vmem:[#allocation6] sm:$0x1] %vm29_vm5, %v281_v3  ;;  %s222_s22 = sshll.u32 %s282_s21, 4  ;;  %s224_s24 = sshll.u32 %s408_s5, 4  ;;  %s223_s22 = int_to_ptr.vmem [resolvable:$true] %s222_s22  ;;  %s225_s24 = int_to_ptr.hbm [resolvable:$true] %s224_s24 }
   0x9   :  { %v172_v42 = vadd.f32 %v171_v39, %v170_v38  ;;  %v139_v48 = vsel %vm138_vm4, %v137_v43, 0.0  ;;  %v165_v49 = vmul.f32 %v156_v46, %v156_v46  ;;  %v166_v53 = vmul.f32 %v157_v51, %v157_v51 }
   0xa   :  { %v326_v5 = vld [vmem:[#allocation2] sm:$0xff]  ;;  %v119_v25 = vadd.f32 %v118_v22, %v117_v23  ;;  %v175_v50 = vsel %vm169_vm3, %v164_v44, 0.0  ;;  %v167_v60 = vmul.f32 %v158_v57, %v158_v57 }
   0xb   :  { %v174_v47 = vadd.f32 %v173_v45, %v172_v42  ;;  %v177_v54 = vsel %vm169_vm3, %v165_v49, 0.0  ;;  %v179_v61 = vsel %vm169_vm3, %v166_v53, 0.0  ;;  %v57_v11 = vld [vmem:[#allocation3] sm:$0xff] }
   0xc   :  { %v121_v27 = vadd.f32 %v120_v26, %v119_v25  ;;  %v181_v1 = vsel %vm169_vm3, %v167_v60, 0.0  ;;  %v95_v21 = vld [vmem:[#allocation5] sm:$0xff] }
   0xd   :  { %v176_v52 = vadd.f32 %v175_v50, %v174_v47  ;;  %v69_v56 = vld [vmem:[#allocation4] sm:$0xff] }
   0xf   :  { %v178_v58 = vadd.f32 %v177_v54, %v176_v52  ;;  %v109_v45 = vld [vmem:[#allocation6] sm:$0x1] }
  0x11   :  { %v180_v63 = vadd.f32 %v179_v61, %v178_v58 }
  0x13   :  { %v182_v2 = vadd.f32 %v181_v1, %v180_v63 }
  0x75   :  { %v49_v6 = vpop.xlane.xlu0 %48 }
  0x76   :  { %v329_v7 = vmax.f32 %v326_v5, %v49_v6  ;;  %v72_v13 = vpop.permute.xlu1 %71 }
  0x77   :  { %vm73_vm2 = vcmp.eq.s32.totalorder %v41_v18, %v72_v13 }
  0x78   :  { %v58_v8 = vsub.f32 %v326_v5, %v329_v7  ;;  %79 = vst.msk [vmem:[#allocation2] sm:$0xff] %vm27_vm0, %v329_v7  ;;  %53 = vperm.xlu0 %245, %v329_v7   ;;  %v74_v24 = vsel %vm73_vm2, %v38_v0, 0.0 }
  0x79   :  { %75 = vadd.xlane.f32.xlu2 %v74_v24 }
  0x7a   :  { %v59_v9 = vmul.f32 1.442695, %v58_v8 }
  0x7f   :  { %v86_v18 = vld [vmem:[#allocation2] sm:$0xff] }
  0x81   :  { %122 = vadd.xlane.f32.xlu2 %v121_v27 }
  0x89   :  { %140 = vadd.xlane.f32.xlu2 %v139_v48 }
  0xea   :  { %v54_v28 = vpop.permute.xlu0 %53 }
  0xeb   :  { %v56_v29 = vsub.f32 %v38_v0, %v54_v28  ;;  %v168_v0 = vmul.f32 %v159_v62, %v159_v62 }
  0xec   :  { %v76_v55 = vpop.xlane.xlu2 %75 }
  0xed   :  { %v62_v30 = vmul.f32 1.442695, %v56_v29  ;;  %v77_v59 = vadd.f32 %v76_v55, %v69_v56  ;;  %v183_v4 = vsel %vm169_vm3, %v168_v0, 0.0 }
  0xee   :  { %v184_v6 = vadd.f32 %v183_v4, %v182_v2 }
  0xef   :  { %247 = vpow2.f32 %v62_v30  ;;  %78 = vst.msk [vmem:[#allocation4] sm:$0xff] %vm27_vm0, %v77_v59 }
  0xf0   :  { %185 = vadd.xlane.f32.xlu2 %v184_v6  ;;  %249 = vpow2.f32 %v59_v9 }
  0xf4   :  { %v123_v23 = vpop.xlane.xlu2 %122 }
  0xf5   :  { %v248_v31 = vpop.eup %247  ;;  %v124_v24 = vrot.slane %v123_v23, 4 }
  0xf6   :  { %64 = vadd.xlane.f32.xlu1 %v248_v31  ;;  %v250_v10 = vpop.eup %249  ;;  %v88_v19 = vld [vmem:[#allocation4] sm:$0xff] }
  0xf7   :  { %v61_v12 = vmul.f32 %v250_v10, %v57_v11  ;;  %v125_v25 = vadd.f32 %v124_v24, %v123_v23 }
  0xf9   :  { %v126_v26 = vrot.slane %v125_v25, 2 }
  0xfb   :  { %v127_v27 = vadd.f32 %v126_v26, %v125_v25 }
  0xfc   :  { %v141_v30 = vpop.xlane.xlu2 %140 }
  0xfd   :  { %v128_v28 = vrot.slane %v127_v27, 1  ;;  %v142_v31 = vrot.slane %v141_v30, 4 }
  0xff   :  { %v129_v29 = vadd.f32 %v128_v28, %v127_v27  ;;  %v143_v32 = vadd.f32 %v142_v31, %v141_v30 }
 0x101   :  { %233 = vpush %v129_v29  ;;  %v144_v33 = vrot.slane %v143_v32, 2 }
 0x103   :  { %v145_v34 = vadd.f32 %v144_v33, %v143_v32 }
 0x105   :  { %v146_v35 = vrot.slane %v145_v34, 1 }
 0x107   :  { %v147_v38 = vadd.f32 %v146_v35, %v145_v34 }
 0x109   :  { %235 = vpush %v147_v38 }
 0x132   :  { %s234_s4 = spop %233 }
 0x133   :  { %v131_v44 = vstv %s234_s4 }
 0x134   :  { %v132_v46 = vadd.f32 %v131_v44, %v109_v45 }
 0x136   :  { %134 = vst.msk [vmem:[#allocation6] sm:$0x1] %vm29_vm5, %v132_v46 }
 0x13a   :  { %s236_s19 = spop %235 }
 0x13b   :  { %v149_v52 = vstv %s236_s19 }
 0x13d   :  { %v136_v50 = vld [vmem:[#allocation6] sm:$0x1] }
 0x13e   :  { %v150_v53 = vadd.f32 %v149_v52, %v136_v50 }
 0x140   :  { %151 = vst.msk [vmem:[#allocation6] sm:$0x1] %vm29_vm5, %v150_v53 }
 0x147   :  { %v160_v3 = vld [vmem:[#allocation6] sm:$0x1] }
 0x163   :  { %v186_v36 = vpop.xlane.xlu2 %185 }
 0x164   :  { %v187_v37 = vrot.slane %v186_v36, 4 }
 0x166   :  { %v188_v39 = vadd.f32 %v187_v37, %v186_v36 }
 0x168   :  { %v189_v40 = vrot.slane %v188_v39, 2 }
 0x169   :  { %v65_v13 = vpop.xlane.xlu1 %64 }
 0x16a   :  { %v66_v14 = vadd.f32 %v65_v13, %v61_v12  ;;  %v190_v41 = vadd.f32 %v189_v40, %v188_v39 }
 0x16c   :  { %68 = vst.msk [vmem:[#allocation3] sm:$0xff] %vm27_vm0, %v66_v14  ;;  %v191_v42 = vrot.slane %v190_v41, 1 }
 0x16e   :  { %v192_v43 = vadd.f32 %v191_v42, %v190_v41 }
 0x170   :  { %237 = vpush %v192_v43 }
 0x173   :  { %v83_v15 = vld [vmem:[#allocation3] sm:$0xff] }
 0x174   :  { %251 = vlog2.f32 %v83_v15 }
 0x17a   :  { %v252_v16 = vpop.eup %251 }
 0x17b   :  { %v85_v17 = vmul.f32 0.6931472, %v252_v16 }
 0x17d   :  { %v87_v20 = vadd.f32 %v86_v18, %v85_v17 }
 0x17f   :  { %v89_v22 = vsub.f32 %v87_v20, %v88_v19 }
 0x181   :  { %v98_v5 = vadd.f32 %v95_v21, %v89_v22 }
 0x183   :  { %99 = vst.msk [vmem:[#allocation5] sm:$0xff] %vm27_vm0, %v98_v5 }
 0x18a   :  { %v199_v7 = vld [vmem:[#allocation5] sm:$0xff] }
 0x18b   :  { %v200_v8 = vsel %vm27_vm0, %v199_v7, 0.0 }
 0x18c   :  { %201 = vadd.xlane.f32.xlu2 %v200_v8 }
 0x1a1   :  { %s238_s0 = spop %237 }
 0x1a2   :  { %v194_v57 = vstv %s238_s0 }
 0x1a3   :  { %v195_v58 = vadd.f32 %v194_v57, %v160_v3 }
 0x1a5   :  { %196 = vst.msk [vmem:[#allocation6] sm:$0x1] %vm29_vm5, %v195_v58 }
 0x1ac   :  { %v212_v59 = vld [vmem:[#allocation6] sm:$0x1] }
 0x1ad   :  { %v213_v62 = vmul.f32 0.0005, %v212_v59 }
 0x1ff   :  { %v202_v47 = vpop.xlane.xlu2 %201 }
 0x200   :  { %v203_v48 = vrot.slane %v202_v47, 4 }
 0x202   :  { %v204_v49 = vadd.f32 %v203_v48, %v202_v47 }
 0x204   :  { %v205_v51 = vrot.slane %v204_v49, 2 }
 0x206   :  { %v206_v54 = vadd.f32 %v205_v51, %v204_v49 }
 0x208   :  { %v207_v55 = vrot.slane %v206_v54, 1 }
 0x20a   :  { %v208_v56 = vadd.f32 %v207_v55, %v206_v54 }
 0x20c   :  { %239 = vpush %v208_v56 }
 0x23d   :  { %s240_s20 = spop %239 }
 0x23e   :  { %v210_v60 = vstv %s240_s20 }
 0x23f   :  { %v211_v61 = vmul.f32 0.125, %v210_v60 }
 0x241   :  { %v214_v63 = vadd.f32 %v213_v62, %v211_v61 }
 0x243   :  { %216 = vst.msk [vmem:[#allocation7] sm:$0x1] %vm29_vm5, %v214_v63 }
 0x244   :  { %227 = dma.vmem_to_hbm [thread:$0]  %s223_s22, 16, %s225_s24, [#allocation8]  }
 0x245   :  { %277 = dma.done.wait [#allocation8], 16  }
 0x246   :  { %278 = vsyncadd [#allocation8], 4294967280 }
 0x247   :  { %232 = vsyncpa [#allocation8], 1 }

</bundles_post_ra>
